<compile_context>
chip_gen: v7x
topology: tpu7x:2x2x1
jax: 0.10.0
libtpu: 0.0.40
codegen_flags: <defaults>
</compile_context>

<pallas_src>
import functools

import jax
import jax.numpy as jnp
from jax.experimental import pallas as pl
from jax.experimental.pallas import tpu as pltpu


# ----------------------------------------------------------------------------
# Pallas kernel
# ----------------------------------------------------------------------------
def skfusion_kernel(*refs, height, inv_hw):
    """One grid step: a block of batch elements, all `height` branches resident.

    refs = (x_0, ..., x_{height-1}, w1_t, w2_t, out)
      x_i : (GB, C, HW)    branch i features (channels-major, spatial flattened)
      w1_t: (C, d)         Conv2d(C, d, 1, bias=False).weight, pre-transposed
      w2_t: (d, height*C)  Conv2d(d, height*C, 1, bias=False).weight, pre-transposed
      out : (GB, C, HW)
    """
    x_refs = refs[:height]
    w1_ref = refs[height]
    w2_ref = refs[height + 1]
    out_ref = refs[height + 2]

    xs = [r[...].astype(jnp.float32) for r in x_refs]           # height x (GB, C, HW)
    feats_sum = xs[0]
    for x in xs[1:]:
        feats_sum = feats_sum + x

    # Global average pool over the spatial (lane) axis.
    pooled = jnp.sum(feats_sum, axis=-1) * inv_hw                # (GB, C)

    # meta-MLP: 1x1 convs == matmuls (tiny; f32 accumulation).
    hidden = jnp.dot(pooled, w1_ref[...],
                     preferred_element_type=jnp.float32)         # (GB, d)
    hidden = jnp.maximum(hidden, 0.0)
    logits = jnp.dot(hidden, w2_ref[...],
                     preferred_element_type=jnp.float32)         # (GB, height*C)

    # Softmax over the `height` (branch) axis using static per-branch channel
    # slices (avoids a 3-D reshape / transpose inside the kernel).
    C = xs[0].shape[1]
    chunks = [logits[:, h * C:(h + 1) * C] for h in range(height)]   # height x (GB, C)
    m = chunks[0]
    for c in chunks[1:]:
        m = jnp.maximum(m, c)
    exps = [jnp.exp(c - m) for c in chunks]
    denom = exps[0]
    for e in exps[1:]:
        denom = denom + e
    inv = 1.0 / denom                                            # (GB, C)

    # Weighted fusion: out = sum_h attn_h[:, :, None] * x_h
    out = (exps[0] * inv)[:, :, None] * xs[0]
    for h in range(1, height):
        out = out + (exps[h] * inv)[:, :, None] * xs[h]
    out_ref[...] = out.astype(out_ref.dtype)


# ----------------------------------------------------------------------------
# Wrapper
# ----------------------------------------------------------------------------
def _pick_batch_block(B, C, HW, height, itemsize, vmem_budget=8 * 1024 * 1024):
    """Largest divisor of B whose tile fits the VMEM budget; keep >=2 grid steps."""
    # double-buffered inputs + double-buffered output + f32 working set
    per_batch = (2 * height + 2) * C * HW * itemsize + (height + 1) * C * HW * 4
    cap = max(1, int(vmem_budget // per_batch))
    if B >= 2:
        cap = max(1, min(cap, B // 2))   # leave >= 2 grid steps (v7x megacore)
    bb = 1
    for cand in range(1, min(B, cap) + 1):
        if B % cand == 0:
            bb = cand
    return bb


def sk_fusion(in_feats, w1, w2):
    """JAX/Pallas equivalent of SKFusion.forward.

    in_feats: list of `height` arrays, each (B, C, H, W)
    w1: (d, C)          weight of Conv2d(C, d, 1, bias=False)   (kernel dims squeezed)
    w2: (height*C, d)   weight of Conv2d(d, height*C, 1, bias=False)
    """
    height = len(in_feats)
    B, C, H, W = in_feats[0].shape
    HW = H * W
    d = w1.shape[0]

    xs = [f.reshape(B, C, HW) for f in in_feats]      # free reshape (merge H, W)
    w1_t = jnp.transpose(w1)                          # (C, d)          tiny
    w2_t = jnp.transpose(w2)                          # (d, height*C)   tiny

    gb = _pick_batch_block(B, C, HW, height, jnp.dtype(in_feats[0].dtype).itemsize)
    grid = (B // gb,)

    x_spec = pl.BlockSpec((gb, C, HW), lambda b: (b, 0, 0))
    in_specs = [x_spec] * height + [
        pl.BlockSpec((C, d), lambda b: (0, 0)),
        pl.BlockSpec((d, height * C), lambda b: (0, 0)),
    ]

    out = pl.pallas_call(
        functools.partial(skfusion_kernel, height=height, inv_hw=1.0 / HW),
        out_shape=jax.ShapeDtypeStruct((B, C, HW), in_feats[0].dtype),
        grid=grid,
        in_specs=in_specs,
        out_specs=pl.BlockSpec((gb, C, HW), lambda b: (b, 0, 0)),
        compiler_params=pltpu.CompilerParams(
            dimension_semantics=("parallel",),
        ),
    )(*xs, w1_t, w2_t)

    return out.reshape(B, C, H, W)


# ----------------------------------------------------------------------------
# Pure-JAX reference (for correctness check)
# ----------------------------------------------------------------------------
def sk_fusion_ref(in_feats, w1, w2):
    height = len(in_feats)
    B, C, H, W = in_feats[0].shape
    x = jnp.stack(in_feats, axis=1)                   # (B, height, C, H, W)
    feats_sum = jnp.sum(x, axis=1)                    # (B, C, H, W)
    pooled = jnp.mean(feats_sum, axis=(2, 3))         # (B, C)
    hidden = jnp.maximum(pooled @ w1.T, 0.0)          # (B, d)
    logits = hidden @ w2.T                            # (B, height*C)
    attn = jax.nn.softmax(logits.reshape(B, height, C), axis=1)
    return jnp.sum(x * attn[:, :, :, None, None], axis=1)


# ----------------------------------------------------------------------------
if __name__ == "__main__":
    # SKFusion(dim=32, height=2, reduction=8) at small spatial size 16x16, B=2.
    B, C, H, W = 2, 32, 16, 16
    height, reduction = 2, 8
    d = max(C // reduction, 4)

    key = jax.random.PRNGKey(0)
    k_x1, k_x2, k_w1, k_w2 = jax.random.split(key, 4)

    x1 = jax.random.normal(k_x1, (B, C, H, W), jnp.float32)
    x2 = jax.random.normal(k_x2, (B, C, H, W), jnp.float32)
    # Conv2d weights with the trailing 1x1 kernel dims squeezed out.
    w1 = jax.random.normal(k_w1, (d, C), jnp.float32) * 0.1
    w2 = jax.random.normal(k_w2, (height * C, d), jnp.float32) * 0.1

    out = sk_fusion([x1, x2], w1, w2)
    out = jax.block_until_ready(out)

    ref = sk_fusion_ref([x1, x2], w1, w2)
    assert out.shape == (B, C, H, W), out.shape
    assert jnp.allclose(out, ref, atol=1e-5, rtol=1e-5), (
        float(jnp.max(jnp.abs(out - ref)))
    )

    print("KERNEL_OK")
</pallas_src>

<mosaic_0001>
module attributes {stable_mosaic.version = 11 : i64} {
  func.func @skfusion_kernel(%arg0: i32, %arg1: memref<1x32x256xf32, #tpu.memory_space<vmem>>, %arg2: memref<1x32x256xf32, #tpu.memory_space<vmem>>, %arg3: memref<32x4xf32, #tpu.memory_space<vmem>>, %arg4: memref<4x64xf32, #tpu.memory_space<vmem>>, %arg5: memref<1x32x256xf32, #tpu.memory_space<vmem>>) attributes {dimension_semantics = [#tpu.dimension_semantics<parallel>], iteration_bounds = array<i64: 2>, scalar_prefetch = 0 : i64, scratch_operands = 0 : i64, tpu.core_type = #tpu.core_type<tc>, window_params = [{transform_indices = @transform_0, window_bounds = array<i64: 1, 32, 256>}, {transform_indices = @transform_1, window_bounds = array<i64: 1, 32, 256>}, {pipeline_mode = #tpu.pipeline_mode<synchronous>, transform_indices = @transform_2, window_bounds = array<i64: 32, 4>}, {pipeline_mode = #tpu.pipeline_mode<synchronous>, transform_indices = @transform_3, window_bounds = array<i64: 4, 64>}, {transform_indices = @transform_4, window_bounds = array<i64: 1, 32, 256>}]} {
    %c0 = arith.constant 0 : index
    %c0_0 = arith.constant 0 : index
    %c0_1 = arith.constant 0 : index
    %0 = vector.load %arg1[%c0, %c0_0, %c0_1] : memref<1x32x256xf32, #tpu.memory_space<vmem>>, vector<1x32x256xf32>
    %c0_2 = arith.constant 0 : index
    %c0_3 = arith.constant 0 : index
    %c0_4 = arith.constant 0 : index
    %1 = vector.load %arg2[%c0_2, %c0_3, %c0_4] : memref<1x32x256xf32, #tpu.memory_space<vmem>>, vector<1x32x256xf32>
    %2 = arith.addf %0, %1 : vector<1x32x256xf32>
    %cst = arith.constant dense<0.000000e+00> : vector<1x32xf32>
    %3 = vector.multi_reduction <add>, %2, %cst [2] : vector<1x32x256xf32> to vector<1x32xf32>
    %cst_5 = arith.constant 3.906250e-03 : f32
    %4 = vector.broadcast %cst_5 : f32 to vector<1x32xf32>
    %5 = arith.mulf %3, %4 : vector<1x32xf32>
    %c0_6 = arith.constant 0 : index
    %c0_7 = arith.constant 0 : index
    %6 = vector.load %arg3[%c0_6, %c0_7] : memref<32x4xf32, #tpu.memory_space<vmem>>, vector<32x4xf32>
    %cst_8 = arith.constant dense<0.000000e+00> : vector<1x4xf32>
    %7 = tpu.matmul %5, %6, %cst_8 {dimension_numbers = #tpu.dot_dimension_numbers<[1], [0], [0], [1], [0, 0, 1, 1], [], []>} : vector<1x32xf32>, vector<32x4xf32>, vector<1x4xf32> -> vector<1x4xf32>
    %cst_9 = arith.constant 0.000000e+00 : f32
    %8 = vector.broadcast %cst_9 : f32 to vector<1x4xf32>
    %9 = arith.maximumf %7, %8 : vector<1x4xf32>
    %c0_10 = arith.constant 0 : index
    %c0_11 = arith.constant 0 : index
    %10 = vector.load %arg4[%c0_10, %c0_11] : memref<4x64xf32, #tpu.memory_space<vmem>>, vector<4x64xf32>
    %cst_12 = arith.constant dense<0.000000e+00> : vector<1x64xf32>
    %11 = tpu.matmul %9, %10, %cst_12 {dimension_numbers = #tpu.dot_dimension_numbers<[1], [0], [0], [1], [0, 0, 1, 1], [], []>} : vector<1x4xf32>, vector<4x64xf32>, vector<1x64xf32> -> vector<1x64xf32>
    %12 = vector.extract_strided_slice %11 {offsets = [0, 0], sizes = [1, 32], strides = [1, 1]} : vector<1x64xf32> to vector<1x32xf32>
    %13 = vector.extract_strided_slice %11 {offsets = [0, 32], sizes = [1, 32], strides = [1, 1]} : vector<1x64xf32> to vector<1x32xf32>
    %14 = arith.maximumf %12, %13 : vector<1x32xf32>
    %15 = arith.subf %12, %14 : vector<1x32xf32>
    %16 = math.exp %15 : vector<1x32xf32>
    %17 = arith.subf %13, %14 : vector<1x32xf32>
    %18 = math.exp %17 : vector<1x32xf32>
    %19 = arith.addf %16, %18 : vector<1x32xf32>
    %cst_13 = arith.constant 1.000000e+00 : f32
    %20 = vector.broadcast %cst_13 : f32 to vector<1x32xf32>
    %21 = arith.divf %20, %19 : vector<1x32xf32>
    %22 = arith.mulf %16, %21 : vector<1x32xf32>
    %23 = vector.shape_cast %22 : vector<1x32xf32> to vector<1x32x1xf32>
    %24 = vector.broadcast %23 : vector<1x32x1xf32> to vector<1x32x256xf32>
    %25 = arith.mulf %24, %0 : vector<1x32x256xf32>
    %26 = arith.mulf %18, %21 : vector<1x32xf32>
    %27 = vector.shape_cast %26 : vector<1x32xf32> to vector<1x32x1xf32>
    %28 = vector.broadcast %27 : vector<1x32x1xf32> to vector<1x32x256xf32>
    %29 = arith.mulf %28, %1 : vector<1x32x256xf32>
    %30 = arith.addf %25, %29 : vector<1x32x256xf32>
    %c0_14 = arith.constant 0 : index
    %c0_15 = arith.constant 0 : index
    %c0_16 = arith.constant 0 : index
    %31 = vector.load %arg5[%c0_14, %c0_15, %c0_16] : memref<1x32x256xf32, #tpu.memory_space<vmem>>, vector<1x32x256xf32>
    tpu.vector_store %arg5[%c0_14, %c0_15, %c0_16], %30 {strides = array<i32>} : memref<1x32x256xf32, #tpu.memory_space<vmem>>, vector<1x32x256xf32>,
    return
  }
  func.func @transform_0(%arg0: i32) -> (i32, i32, i32) {
    %c0_i32 = arith.constant 0 : i32
    %c0_i32_0 = arith.constant 0 : i32
    %c0_i32_1 = arith.constant 0 : i32
    return %arg0, %c0_i32, %c0_i32_0 : i32, i32, i32
  }
  func.func @transform_1(%arg0: i32) -> (i32, i32, i32) {
    %c0_i32 = arith.constant 0 : i32
    %c0_i32_0 = arith.constant 0 : i32
    %c0_i32_1 = arith.constant 0 : i32
    return %arg0, %c0_i32, %c0_i32_0 : i32, i32, i32
  }
  func.func @transform_2(%arg0: i32) -> (i32, i32) {
    %c0_i32 = arith.constant 0 : i32
    %c0_i32_0 = arith.constant 0 : i32
    %c0_i32_1 = arith.constant 0 : i32
    return %c0_i32, %c0_i32_0 : i32, i32
  }
  func.func @transform_3(%arg0: i32) -> (i32, i32) {
    %c0_i32 = arith.constant 0 : i32
    %c0_i32_0 = arith.constant 0 : i32
    %c0_i32_1 = arith.constant 0 : i32
    return %c0_i32, %c0_i32_0 : i32, i32
  }
  func.func @transform_4(%arg0: i32) -> (i32, i32, i32) {
    %c0_i32 = arith.constant 0 : i32
    %c0_i32_0 = arith.constant 0 : i32
    %c0_i32_1 = arith.constant 0 : i32
    return %arg0, %c0_i32, %c0_i32_0 : i32, i32, i32
  }
}

</mosaic_0001>

<bundles_post_ra>
// kernel: tpu_custom_call.1
= control target key start
LH: loop header
LB: loop body
LE: loop exit
PB: predicated region body
PF: predicated region fallthrough
CT: control target
= control target key end

     0   :  { %9 = vsyncpa [#allocation3], 0  ;;  %s1295_s0 = inlined_call_operand.hbm [shape: f32[2,32,256], index: 0, kind: input, shape index: {}]   ;;  %s1296_s1 = inlined_call_operand.hbm [shape: f32[2,32,256], index: 1, kind: input, shape index: {}]   ;;  %s1297_s2 = inlined_call_operand.vmem [shape: f32[32,4], index: 2, kind: input, shape index: {}]   ;;  %s1298_s3 = inlined_call_operand.vmem [shape: f32[4,64], index: 3, kind: input, shape index: {}]   ;;  %s1299_s4 = inlined_call_operand.hbm [shape: f32[2,32,256], index: 4, kind: output, shape index: {}]  }
   0x1   :  { %11 = vsyncpa [#allocation3 + $0x1], 0 }
   0x2   :  { %12 = vsyncpa [#allocation6], 0 }
   0x3   :  { %14 = vsyncpa [#allocation6 + $0x1], 0 }
   0x4   :  { %15 = vsyncpa [#allocation4], 0 }
   0x5   :  { %17 = vsyncpa [#allocation4 + $0x1], 0  ;;  %s981_s15 = smov 0   ;;  %s983_s16 = smov 0  }
   0x6   :  { %s985_s17 = smov 0   ;;  %s987_s18 = smov 0  }
   0x7 LB: > { %s1002_s19 = sadd.s32 4294967295, %s942_s18   ;;  %s693_s20 = sadd.s32 4294967294, %s942_s18   ;;  %s942_s18 = sphi %s987_s18, %s1315_s18   ;;  %s938_s17 = sphi %s985_s17, %s1314_s17   ;;  %s934_s16 = sphi %s983_s16, %s1313_s16   ;;  %s930_s15 = sphi %s981_s15, %s1312_s15  }
   0x8   : > { %s1006_s21 = sadd.s32 1, %s942_s18   ;;  %s30_s22 = sadd.s32 1, %s938_s17 }
   0x9   : > { %s27_s23 = ssub.s32 %s942_s18, %s1006_s21  ;;  %p37_p0 = scmp.ne.s32.totalorder %s938_s17, %s934_s16 }
   0xa   : > { %p28_p1 = scmp.eq.s32.totalorder %s27_s23, 0  ;;  %p38_p2 = scmp.eq.s32.totalorder %s942_s18, 0 }
   0xb   : > { %p43_p3 = scmp.ne.s32.totalorder %s934_s16, %s930_s15  ;;  %p44_p4 = scmp.eq.s32.totalorder %s1002_s19, 0 }
   0xc   : > { %s1018_s24 = scalar_select %p28_p1, %s938_s17, %s30_s22  }
   0xd   : > { %p1020_p5 = por %p38_p2, %p37_p0  ;;  %p1024_p6 = por %p44_p4, %p43_p3 }
   0xe   : > { %p135_p7 = scmp.eq.s32.totalorder %s1002_s19, 1  ;;  %p141_p8 = scmp.eq.s32.totalorder %s693_s20, 1 }
   0xf   : > { %s1303_s26 = scalar_select %p1024_p6, 1, 0 }
  0x10   : > { %p763_p10 = scmp.lt.s32.totalorder %s942_s18, 2  ;;  %p1031_p11 = por %p135_p7, %p37_p0 }
  0x11   : > { %p1035_p12 = por %p141_p8, %p43_p3  ;;  %s1040_s29 = sand.u32 1, %s938_s17  }
  0x12   : > { %s1304_s27 = scalar_select %p1031_p11, 1, 0 }
  0x13   : > { %s1305_s28 = scalar_select %p1035_p12, 1, 0 }
  0x14   : > { %s714_s30 = sshll.u32 %s942_s18, 10  ;;  %s696_s5 = sshll.u32 %s1040_s29, 6 }
  0x15   : > { %s1049_s8 = scalar_lea.hbm %s1295_s0, %s714_s30  ;;  %s171_s9 = scalar_lea.vmem [#allocation2], %s696_s5 }
  0x16   : > { %s178_s10 = sshll.u32 %s171_s9, 4  ;;  %p1055_p13 = pnand %p763_p10, %p1020_p5  ;;  %s1059_s10 = int_to_ptr.vmem [resolvable:$true] %s178_s10 }
  0x17   : > { %s168_s12 = scalar_lea.sflag [#allocation3], %s1040_s29  ;;  %s812_s13 = scalar_lea.hbm %s1049_s8, 1024 }
  0x18   : > { %p813_p0 = scmp.ne.s32.totalorder %s1049_s8, %s812_s13  ;;  %p814_p1 = pneg %p1055_p13 }
  0x19   : > { %s817_s22 = scalar_lea.hbm %s1295_s0, 2048  ;;  %p818_p4 = scmp.lt.u32.totalorder %s1049_s8, %s1295_s0 }
  0x1a   : > { %p815_p2 = pnand %p814_p1, %p813_p0  ;;  %p819_p5 = scmp.lt.u32.totalorder %s817_s22, %s812_s13 }
  0x1b   : > { %p821_p8 = scmp.lt.u32.totalorder %s812_s13, %s1049_s8 }
  0x1c   : > { %p816_p3 = pneg %p815_p2  ;;  %p820_p7 = por %p819_p5, %p818_p4 }
  0x1e   : > { %p822_p10 = por %p821_p8, %p820_p7 }
  0x20   : > { %p823_p9 = pnand %p822_p10, %p816_p3 }
  0x22   : > { %826 = shalt.err (!%p823_p9)
}
  0x23   : > { %s827_s6 = scalar_lea.vmem %s1059_s10, 1024  ;;  %s944_s7 = smov [#allocation2]  }
  0x24   : > { %p828_p0 = scmp.ne.s32.totalorder %s1059_s10, %s827_s6  ;;  %s832_s9 = sshll.u32 %s944_s7, 4  ;;  %s833_s9 = int_to_ptr.vmem [resolvable:$false] %s832_s9 }
  0x25   : > { %s834_s14 = scalar_lea.vmem %s833_s9, 2048  ;;  %p835_p11 = scmp.lt.s32.totalorder %s1059_s10, %s833_s9 }
  0x26   : > { %p830_p2 = pnand %p828_p0, %p814_p1  ;;  %p836_p4 = scmp.lt.s32.totalorder %s834_s14, %s827_s6 }
  0x28   : > { %p831_p12 = pneg %p830_p2  ;;  %p837_p5 = por %p836_p4, %p835_p11 }
  0x2a   : > { %p838_p7 = pnand %p837_p5, %p831_p12 }
  0x2c   : > { %841 = shalt.err (!%p838_p7)
}
  0x2d   : > { %s945_s13 = smov 256   ;;  %s946_s20 = smov 16  }
  0x2e   : > { %755 = dma.hbm_to_vmem [thread:$0]  (!%p1055_p13), %s1049_s8, 1024, %s1059_s10, %s168_s12, %s945_s13, %s945_s13, %s946_s20  }
  0x2f   : > { %p702_p9 = scmp.ge.s32.totalorder %s942_s18, 1  ;;  %p207_p11 = scmp.lt.s32.totalorder %s942_s18, 3 }
  0x30   : > { %s1103_s6 = scalar_lea.hbm %s1296_s1, %s714_s30  ;;  %s192_s7 = scalar_lea.vmem [#allocation5], %s696_s5 }
  0x31   : > { %p1094_p12 = pnand %p702_p9, %p207_p11  ;;  %s199_s9 = sshll.u32 %s192_s7, 4  ;;  %s1107_s9 = int_to_ptr.vmem [resolvable:$true] %s199_s9 }
  0x32   : > { %s189_s8 = scalar_lea.sflag [#allocation6], %s1040_s29  ;;  %s842_s10 = scalar_lea.hbm %s1103_s6, 1024 }
  0x33   : > { %p843_p3 = scmp.ne.s32.totalorder %s1103_s6, %s842_s10  ;;  %s847_s30 = scalar_lea.hbm %s1296_s1, 2048 }
  0x34   : > { %p848_p0 = scmp.lt.u32.totalorder %s1103_s6, %s1296_s1  ;;  %p849_p2 = scmp.lt.u32.totalorder %s847_s30, %s842_s10 }
  0x35   : > { %p845_p8 = pnand %p843_p3, %p814_p1  ;;  %p851_p5 = scmp.lt.u32.totalorder %s842_s10, %s1103_s6 }
  0x36   : > { %p850_p4 = por %p849_p2, %p848_p0 }
  0x37   : > { %p846_p10 = pneg %p845_p8 }
  0x38   : > { %p852_p7 = por %p851_p5, %p850_p4 }
  0x3a   : > { %p853_p9 = pnand %p852_p7, %p846_p10 }
  0x3c   : > { %856 = shalt.err (!%p853_p9)
}
  0x3d   : > { %s857_s5 = scalar_lea.vmem %s1107_s9, 1024  ;;  %s947_s7 = smov [#allocation5]  }
  0x3e   : > { %p858_p11 = scmp.ne.s32.totalorder %s1107_s9, %s857_s5  ;;  %s862_s12 = sshll.u32 %s947_s7, 4  ;;  %s863_s12 = int_to_ptr.vmem [resolvable:$false] %s862_s12 }
  0x3f   : > { %s864_s14 = scalar_lea.vmem %s863_s12, 2048  ;;  %p865_p6 = scmp.lt.s32.totalorder %s1107_s9, %s863_s12 }
  0x40   : > { %p860_p3 = pnand %p858_p11, %p814_p1  ;;  %p866_p0 = scmp.lt.s32.totalorder %s864_s14, %s857_s5 }
  0x42   : > { %p861_p8 = pneg %p860_p3  ;;  %p867_p2 = por %p866_p0, %p865_p6 }
  0x44   : > { %p868_p4 = pnand %p867_p2, %p861_p8 }
  0x46   : > { %871 = shalt.err (!%p868_p4)
}
  0x47   : > { %758 = dma.hbm_to_vmem [thread:$0]  (!%p1055_p13), %s1103_s6, 1024, %s1107_s9, %s189_s8, %s945_s13, %s945_s13, %s946_s20  }
  0x48   : > { %211 = sbr.rel (%p1094_p12) target bundleno = 1300 (0x514), region = 36  ;;  %s1141_s10 = sand.u32 (!%p1094_p12), 1, %s934_s16  }
  0x49   : > { %s1144_s30 = sshll.u32 (!%p1094_p12), %s1141_s10, 6  ;;  %s214_s11 = scalar_lea.sflag (!%p1094_p12), [#allocation3], %s1141_s10 }
  0x4a   : > { %s217_s23 = scalar_lea.vmem (!%p1094_p12), [#allocation2], %s1144_s30  ;;  %p1308_p6 = scmp.ne.s32.totalorder (!%p1094_p12), %s1303_s26, 0 }
  0x4f   : > { %917 = dma.done.wait (%p1308_p6), %s214_s11, 1024  }
  0x50   : > { %919 = vsyncadd (%p1308_p6), %s214_s11, 4294966272  ;;  %s223_s29 = scalar_lea.sflag [#allocation6], %s1141_s10  ;;  %s226_s13 = scalar_lea.vmem [#allocation5], %s1144_s30 }
  0x51   : > { %921 = dma.done.wait (%p1308_p6), %s223_s29, 1024  }
  0x52   : > { %923 = vsyncadd (%p1308_p6), %s223_s29, 4294966272  ;;  %v1158_v0 = vld [vmem:[%s217_s23] sm:$0xff]  ;;  %v1160_v1 = vld [vmem:[%s217_s23 + $0x8] sm:$0xff]  ;;  %v948_v31 = vmov 0.0|0.0   ;;  %vm949_vm0 = vmmov 0   ;;  %v950_v35 = vmov 0.0   ;;  %v304_v36 = vlaneseq }
  0x53   : > { %v1162_v2 = vld [vmem:[%s226_s13] sm:$0xff]  ;;  %v1164_v3 = vld [vmem:[%s226_s13 + $0x8] sm:$0xff]  ;;  %v1178_v10 = vld [vmem:[%s217_s23 + $0x10] sm:$0xff]  ;;  %740 = vmatprep.subr.bf16.mxu0 %v948_v31  ;;  %732 = vmatprep.mubr.msk.f32.mxu0 %vm949_vm0, %v950_v35  ;;  %vm315_vm1 = vcmask 130112   ;;  %vm322_vm2 = vcmask 195712   ;;  %vm329_vm3 = vcmask 261312  }
  0x54   : > { %v272_v4 = vadd.f32 %v1162_v2, %v1158_v0  ;;  %v1168_v5 = vld [vmem:[%s217_s23 + $0x20] sm:$0xff]  ;;  %v1170_v6 = vld [vmem:[%s217_s23 + $0x28] sm:$0xff]  ;;  %v273_v7 = vadd.f32 %v1164_v3, %v1160_v1  ;;  %v1184_v13 = vld [vmem:[%s217_s23 + $0x18] sm:$0xff]  ;;  %735 = vmatprep.subr.mxu1 %v950_v35  ;;  %737 = vmatprep.mubr.msk.f32.mxu1 %vm949_vm0, %v950_v35  ;;  %v305_v37 = vand.u32 127, %v304_v36  ;;  %v1218_v38 = vshrl.u32 %v304_v36, 7  ;;  %s951_s14 = smov 96  }
  0x55   : > { %v1174_v8 = vld [vmem:[%s226_s13 + $0x20] sm:$0xff]  ;;  %v1176_v9 = vld [vmem:[%s226_s13 + $0x28] sm:$0xff]  ;;  %v1186_v14 = vld [vmem:[%s226_s13 + $0x10] sm:$0xff]  ;;  %vm331_vm4 = vcmask 261120   ;;  %vm410_vm5 = vcmask 1043456   ;;  %vm406_vm6 = vcmask 31744  }
  0x56   : > { %v276_v11 = vadd.f32 %v1174_v8, %v1168_v5  ;;  %v277_v12 = vadd.f32 %v1176_v9, %v1170_v6  ;;  %v1188_v15 = vld [vmem:[%s226_s13 + $0x18] sm:$0xff]  ;;  %v280_v16 = vadd.f32 %v273_v7, %v272_v4  ;;  %v274_v17 = vadd.f32 %v1186_v14, %v1178_v10  ;;  %v1194_v19 = vld [vmem:[%s217_s23 + $0x30] sm:$0xff]  ;;  %v296_v28 = vld [vmem:[%s1297_s2] sm:$0xff]  ;;  %s952_s11 = smov 32   ;;  %s255_s29 = scalar_lea.vmem [#allocation7], %s1144_s30 }
  0x57   : > { %v275_v18 = vadd.f32 %v1188_v15, %v1184_v13  ;;  %v1196_v20 = vld [vmem:[%s217_s23 + $0x38] sm:$0xff]  ;;  %v1198_v21 = vld [vmem:[%s226_s13 + $0x30] sm:$0xff]  ;;  %v297_v29 = vld [vmem:[%s1297_s2 + $0x8] sm:$0xff]  ;;  %v310_v39 = vadd.s32 4294967288, %v305_v37  ;;  %v317_v41 = vadd.s32 4294967280, %v305_v37  ;;  %v324_v42 = vadd.s32 4294967272, %v305_v37 }
  0x58   : > { %v286_v22 = vadd.f32 %v277_v12, %v276_v11  ;;  %v1200_v23 = vld [vmem:[%s226_s13 + $0x38] sm:$0xff]  ;;  %v278_v24 = vadd.f32 %v1198_v21, %v1194_v19  ;;  %281 = vadd.xlane.f32.xlu0 %v280_v16  ;;  %v741_v30 = vpack.c.bf16 %v297_v29, %v296_v28  ;;  %v298_v32 = vld [vmem:[%s1297_s2 + $0x10] sm:$0xff]  ;;  %v308_v44 = vsub.s32 %v305_v37, %v1218_v38  ;;  %v405_v61 = vld [vmem:[%s1298_s3] sm:$0xf]  ;;  %s716_s23 = sshll.u32 %s1002_s19, 10  ;;  %s597_s13 = sshll.u32 %s255_s29, 4  ;;  %s1251_s13 = int_to_ptr.vmem [resolvable:$true] %s597_s13 }
  0x59   : > { %v283_v25 = vadd.f32 %v275_v18, %v274_v17  ;;  %v279_v26 = vadd.f32 %v1200_v23, %v1196_v20  ;;  %v299_v33 = vld [vmem:[%s1297_s2 + $0x18] sm:$0xff]  ;;  %v313_v46 = vsub.s32 %v310_v39, %v1218_v38  ;;  %v320_v47 = vsub.s32 %v317_v41, %v1218_v38  ;;  %736 = vmatpush3.msk.msra.mxu1 %vm410_vm5, %v405_v61  ;;  %s1249_s26 = scalar_lea.hbm %s1299_s4, %s716_s23  ;;  %s584_s20 = scalar_lea.sflag [#allocation4], %s1141_s10 }
  0x5a   : > { %287 = vadd.xlane.f32.xlu1 %v286_v22  ;;  %742 = vmatpush3.bf16.msra.mxu0 %v741_v30  ;;  %v744_v34 = vpack.c.bf16 %v299_v33, %v298_v32  ;;  %v327_v50 = vsub.s32 %v324_v42, %v1218_v38  ;;  %v509_v30 = vsub.s32 0, %v1218_v38  ;;  %s872_s22 = scalar_lea.vmem %s1251_s13, 1024  ;;  %p1309_p1 = scmp.ne.s32.totalorder %s1304_s27, 0 }
  0x5b   : > { %v289_v27 = vadd.f32 %v279_v26, %v278_v24  ;;  %743 = vmatprep.subr.bf16.mxu0 %v948_v31  ;;  %p873_p13 = scmp.ne.s32.totalorder %s1251_s13, %s872_s22  ;;  %s953_s6 = smov [#allocation7]  }
  0x5c   : > { %284 = vadd.xlane.f32.xlu0 %v283_v25  ;;  %s876_s9 = sshll.u32 %s953_s6, 4  ;;  %s877_s9 = int_to_ptr.vmem [resolvable:$false] %s876_s9 }
  0x5d   : > { %p874_p12 = pnand %p873_p13, %p1309_p1  ;;  %s878_s8 = scalar_lea.vmem %s877_s9, 2048 }
  0x5e   : > { %290 = vadd.xlane.f32.xlu1 %v289_v27  ;;  %745 = vmatpush3.bf16.msra.mxu0 %v744_v34  ;;  %p879_p5 = scmp.lt.s32.totalorder %s1251_s13, %s877_s9  ;;  %p880_p7 = scmp.lt.s32.totalorder %s878_s8, %s872_s22 }
  0x5f   : > { %p875_p10 = pneg %p874_p12 }
  0x60   : > { %p881_p9 = por %p880_p7, %p879_p5 }
  0x62   : > { %p882_p11 = pnand %p881_p9, %p875_p10 }
  0xe5   : > { %v282_v40 = vpop.xlane.xlu0 %281 }
  0xe6   : > { %v292_v45 = vmul.f32 0.00390625, %v282_v40 }
  0xe7   : > { %v288_v43 = vpop.xlane.xlu1 %287 }
  0xe8   : > { %v294_v48 = vmul.f32 0.00390625, %v288_v43  ;;  %v309_v54 = vrot.slane %v292_v45, %v308_v44 }
  0xe9   : > { %v285_v49 = vpop.xlane.xlu0 %284 }
  0xea   : > { %v293_v51 = vmul.f32 0.00390625, %v285_v49  ;;  %v321_v56 = vrot.slane %v294_v48, %v320_v47 }
  0xeb   : > { %v291_v52 = vpop.xlane.xlu1 %290 }
  0xec   : > { %v295_v53 = vmul.f32 0.00390625, %v291_v52  ;;  %v314_v55 = vrot.slane %v293_v51, %v313_v46 }
  0xee   : > { %v328_v57 = vrot.slane %v295_v53, %v327_v50  ;;  %v316_v58 = vsel %vm315_vm1, %v314_v55, %v309_v54 }
  0xef   : > { %v323_v59 = vsel %vm322_vm2, %v321_v56, %v316_v58 }
  0xf0   : > { %v330_v60 = vsel %vm329_vm3, %v328_v57, %v323_v59 }
  0xf1   : > { %733 = vmatmul.mubr.msk.f32.vlgmr.msra.gmra.mrb[0].mxu0 %vm331_vm4, %v330_v60 }
 0x1c4   : > { %v400_v62 = vpop.f32.mrb[0].mxu0 }
 0x1c5   : > { %v404_v63 = vmax.f32 %v400_v62, 0.0  ;;  %v734_v4 = vpop.f32.mrb[1].mxu0 }
 0x1c7   : > { %738 = vmatmul.mubr.msk.f32.vlgmr.msra.gmra.mrb[0].mxu1 %vm406_vm6, %v404_v63 }
 0x29a   : > { %v480_v7 = vpop.f32.mrb[0].mxu1 }
 0x29b   : > { %485 = vrot.lane.b32.xlu0 %v480_v7, %s951_s14  ;;  %v739_v11 = vpop.f32.mrb[1].mxu1 }
 0x30d   : > { %v486_v12 = vpop.permute.xlu0 %485 }
 0x30e   : > { %v488_v16 = vmax.f32 %v480_v7, %v486_v12 }
 0x310   : > { %v489_v17 = vsub.f32 %v480_v7, %v488_v16  ;;  %493 = vrot.lane.b32.xlu1 %v488_v16, %s952_s11 }
 0x312   : > { %v490_v26 = vmul.f32 1.442695, %v489_v17 }
 0x382   : > { %v494_v18 = vpop.permute.xlu1 %493 }
 0x383   : > { %v496_v22 = vsub.f32 %v480_v7, %v494_v18 }
 0x385   : > { %v497_v24 = vmul.f32 1.442695, %v496_v22 }
 0x387   : > { %806 = vpow2.f32 %v497_v24 }
 0x388   : > { %808 = vpow2.f32 %v490_v26 }
 0x391   : > { %v807_v25 = vpop.eup %806 }
 0x392   : > { %500 = vrot.lane.b32.xlu1 %v807_v25, %s951_s14  ;;  %v809_v27 = vpop.eup %808 }
 0x404   : > { %v501_v28 = vpop.permute.xlu1 %500 }
 0x405   : > { %v503_v29 = vadd.f32 %v809_v27, %v501_v28 }
 0x407   : > { %810 = vrcp.f32 %v503_v29 }
 0x411   : > { %v811_v31 = vpop.eup %810 }
 0x412   : > { %535 = vrot.lane.b32.xlu1 %v811_v31, %s952_s11  ;;  %v506_v32 = vmul.f32 %v811_v31, %v809_v27 }
 0x414   : > { %v510_v33 = vrot.slane %v506_v32, %v509_v30 }
 0x416   : > { %516 = vbcast.lane.b32.xlu1 %v510_v33, 264  ;;  %512 = vbcast.lane.b32.xlu0 %v510_v33, 256 }
 0x41a   : > { %524 = vbcast.lane.b32.xlu1 %v510_v33, 280  ;;  %520 = vbcast.lane.b32.xlu0 %v510_v33, 272 }
 0x484   : > { %v536_v34 = vpop.permute.xlu1 %535 }
 0x485   : > { %v538_v35 = vmul.f32 %v807_v25, %v536_v34 }
 0x487   : > { %v542_v36 = vrot.slane %v538_v35, %v509_v30 }
 0x488   : > { %v517_v37 = vpop.permute.xlu1 %516  ;;  %v513_v39 = vpop.permute.xlu0 %512 }
 0x489   : > { %549 = vbcast.lane.b32.xlu1 %v542_v36, 296  ;;  %545 = vbcast.lane.b32.xlu0 %v542_v36, 288  ;;  %v528_v42 = vmul.f32 %v517_v37, %v1178_v10  ;;  %v529_v43 = vmul.f32 %v517_v37, %v1184_v13  ;;  %v526_v47 = vmul.f32 %v513_v39, %v1158_v0 }
 0x48a   : > { %v527_v48 = vmul.f32 %v513_v39, %v1160_v1 }
 0x48c   : > { %v525_v40 = vpop.permute.xlu1 %524  ;;  %v521_v41 = vpop.permute.xlu0 %520 }
 0x48d   : > { %557 = vbcast.lane.b32.xlu1 %v542_v36, 312  ;;  %553 = vbcast.lane.b32.xlu0 %v542_v36, 304  ;;  %v532_v13 = vmul.f32 %v525_v40, %v1194_v19 }
 0x4fb   : > { %v550_v38 = vpop.permute.xlu1 %549  ;;  %v546_v46 = vpop.permute.xlu0 %545 }
 0x4fc   : > { %v561_v44 = vmul.f32 %v550_v38, %v1186_v14  ;;  %v562_v45 = vmul.f32 %v550_v38, %v1188_v15  ;;  %v559_v49 = vmul.f32 %v546_v46, %v1162_v2  ;;  %v560_v50 = vmul.f32 %v546_v46, %v1164_v3 }
 0x4fd   : > { %v533_v14 = vmul.f32 %v525_v40, %v1196_v20  ;;  %v530_v3 = vmul.f32 %v521_v41, %v1168_v5  ;;  %v531_v15 = vmul.f32 %v521_v41, %v1170_v6 }
 0x4fe   : > { %v569_v51 = vadd.f32 %v561_v44, %v528_v42  ;;  %v570_v52 = vadd.f32 %v562_v45, %v529_v43  ;;  %v567_v53 = vadd.f32 %v559_v49, %v526_v47  ;;  %v568_v54 = vadd.f32 %v560_v50, %v527_v48 }
 0x4ff   : > { %v558_v10 = vpop.permute.xlu1 %557  ;;  %v554_v2 = vpop.permute.xlu0 %553 }
 0x500   : > { %577 = vst [vmem:[%s255_s29 + $0x10] sm:$0xff] %v569_v51  ;;  %578 = vst [vmem:[%s255_s29 + $0x18] sm:$0xff] %v570_v52  ;;  %v565_v0 = vmul.f32 %v558_v10, %v1198_v21  ;;  %v566_v1 = vmul.f32 %v558_v10, %v1200_v23  ;;  %v563_v55 = vmul.f32 %v554_v2, %v1174_v8 }
 0x501   : > { %575 = vst [vmem:[%s255_s29] sm:$0xff] %v567_v53  ;;  %576 = vst [vmem:[%s255_s29 + $0x8] sm:$0xff] %v568_v54  ;;  %v564_v19 = vmul.f32 %v554_v2, %v1176_v9 }
 0x502   : > { %v573_v20 = vadd.f32 %v565_v0, %v532_v13  ;;  %v574_v56 = vadd.f32 %v566_v1, %v533_v14  ;;  %v571_v5 = vadd.f32 %v563_v55, %v530_v3 }
 0x503   : > { %v572_v6 = vadd.f32 %v564_v19, %v531_v15 }
 0x504   : > { %581 = vst [vmem:[%s255_s29 + $0x30] sm:$0xff] %v573_v20  ;;  %582 = vst [vmem:[%s255_s29 + $0x38] sm:$0xff] %v574_v56 }
 0x505   : > { %579 = vst [vmem:[%s255_s29 + $0x20] sm:$0xff] %v571_v5  ;;  %580 = vst [vmem:[%s255_s29 + $0x28] sm:$0xff] %v572_v6 }
 0x506   : > { %885 = shalt.err (!%p882_p11)
}
 0x507   : > { %s886_s25 = scalar_lea.hbm %s1249_s26, 1024  ;;  %s890_s12 = scalar_lea.hbm %s1299_s4, 2048 }
 0x508   : > { %p887_p3 = scmp.ne.s32.totalorder %s1249_s26, %s886_s25  ;;  %p891_p2 = scmp.lt.u32.totalorder %s1249_s26, %s1299_s4 }
 0x509   : > { %p892_p4 = scmp.lt.u32.totalorder %s890_s12, %s886_s25  ;;  %p894_p13 = scmp.lt.u32.totalorder %s886_s25, %s1249_s26 }
 0x50a   : > { %p888_p8 = pnand %p887_p3, %p1309_p1 }
 0x50b   : > { %p893_p6 = por %p892_p4, %p891_p2 }
 0x50c   : > { %p889_p0 = pneg %p888_p8 }
 0x50d   : > { %p895_p12 = por %p894_p13, %p893_p6 }
 0x50f   : > { %p896_p10 = pnand %p895_p12, %p889_p0 }
 0x511   : > { %899 = shalt.err (!%p896_p10)
}
 0x512   : > { %s954_s23 = smov 256   ;;  %s955_s29 = smov 16  }
 0x513   : > { %750 = dma.vmem_to_hbm [thread:$0]  (%p1309_p1), %s1251_s13, 1024, %s1249_s26, %s584_s20, %s954_s23, %s954_s23, %s955_s29  }
 0x514 PF: > { %s612_s19 = sand.u32 1, %s930_s15   ;;  %p1310_p5 = scmp.ne.s32.totalorder %s1305_s28, 0 }
 0x515   : > { %p1311_p7 = scmp.ge.s32.totalorder %s942_s18, 2  ;;  %s613_s30 = scalar_lea.sflag [#allocation4], %s612_s19 }
 0x517   : > { %p760_p9 = pnand %p1311_p7, %p1310_p5 }
 0x519   : > { %925 = dma.done.wait (!%p760_p9), %s613_s30, 1024  }
 0x51a   : > { %927 = vsyncadd (!%p760_p9), %s613_s30, 4294966272  ;;  %p20_p11 = scmp.ge.s32.totalorder %s1006_s21, 4   ;;  %s1312_s15 = smov %s934_s16 }
 0x51b   : > { %s1313_s16 = smov %s938_s17  ;;  %s1314_s17 = smov %s1018_s24 }
 0x51c   : > { %s1315_s18 = smov %s1006_s21  ;;  %22 = sbr.rel (!%p20_p11) target bundleno = 7 (0x7), region = 94 }
 0x523   :  { %618 = vsyncpa [#allocation3], 1 }
 0x524   :  { %620 = vsyncpa [#allocation3 + $0x1], 1 }
 0x525   :  { %621 = vsyncpa [#allocation6], 1 }
 0x526   :  { %623 = vsyncpa [#allocation6 + $0x1], 1 }
 0x527   :  { %624 = vsyncpa [#allocation4], 1 }
 0x528   :  { %626 = vsyncpa [#allocation4 + $0x1], 1 }

</bundles_post_ra>
